<compile_context>
chip_gen: v7x
topology: tpu7x:2x2x1
jax: 0.10.0
libtpu: 0.0.40
codegen_flags: <defaults>
</compile_context>

<pallas_src>
from functools import partial

import jax
import jax.numpy as jnp
from jax.experimental import pallas as pl
from jax.experimental.pallas import tpu as pltpu


# ---------------------------------------------------------------------------
# Kernel 1: ConvTranspose2d(Cin, Cout, kernel_size=2, stride=2), NHWC.
# ---------------------------------------------------------------------------
def _upconv2x2_kernel(x_ref, w_ref, b_ref, o_ref):
    """One batch element.

    x_ref: (1, Hin, Win, Cin)   f32
    w_ref: (2, Cin, 2*Cout)     bf16 tap-folded: w_ref[a, ci, b*Cout + c]
    b_ref: (1, 2*Cout)          f32 bias tiled over the b-tap
    o_ref: (1, Hin, 2, Win, 2*Cout)  bf16
           o[0, i, a, j, b*Cout + c] == up[2*i + a, 2*j + b, c]
    """
    xb = x_ref[0].astype(jnp.bfloat16)                       # bf16 MXU operand
    bias = b_ref[0].astype(jnp.float32)[None, None, :]       # hoisted broadcast
    for a in range(2):
        y = jax.lax.dot_general(
            xb, w_ref[a],
            dimension_numbers=(((2,), (0,)), ((), ())),
            preferred_element_type=jnp.float32,
        )
        o_ref[0, :, a, :, :] = (y + bias).astype(o_ref.dtype)


def upconv2x2_pallas(x_nhwc, w_up_mat_bf16, b_up_mat):
    """ConvTranspose2d(k=2, s=2), NHWC.  Returns bf16 (N, 2*Hin, 2*Win, Cout)."""
    N, Hin, Win, Cin = x_nhwc.shape
    two_cout = w_up_mat_bf16.shape[-1]
    cout = two_cout // 2
    out = pl.pallas_call(
        _upconv2x2_kernel,
        out_shape=jax.ShapeDtypeStruct((N, Hin, 2, Win, two_cout), jnp.bfloat16),
        grid=(N,),
        in_specs=[
            pl.BlockSpec((1, Hin, Win, Cin), lambda n: (n, 0, 0, 0)),
            pl.BlockSpec((2, Cin, two_cout), lambda n: (0, 0, 0)),
            pl.BlockSpec((1, two_cout), lambda n: (0, 0)),
        ],
        out_specs=pl.BlockSpec((1, Hin, 2, Win, two_cout),
                               lambda n: (n, 0, 0, 0, 0)),
        compiler_params=pltpu.CompilerParams(dimension_semantics=("parallel",)),
    )(x_nhwc, w_up_mat_bf16, b_up_mat)
    # (N, Hin, 2, Win, 2, Cout) row-major == (N, 2*Hin, 2*Win, Cout): free reshape.
    return out.reshape(N, 2 * Hin, 2 * Win, cout)


# ---------------------------------------------------------------------------
# Kernel 2: fused  pad/crop + concat(channels) + conv3x3 + ReLU + conv3x3, NHWC.
# ---------------------------------------------------------------------------
def _fused_convblock_kernel(up_ref, skip_ref, w1_ref, b1_ref, w2_ref, b2_ref,
                            o_ref, cat_pad, h_pad, *,
                            H, W, c_up, KH, KW,
                            dst_r0, dst_c0, src_r0, src_c0, copy_h, copy_w,
                            up_covers_interior):
    """One batch element, everything resident in VMEM.

    up_ref   : (1, Hu, Wu, c_up)  bf16 (upsampled tensor from kernel 1)
    skip_ref : (1, H,  W,  c_sk)  f32
    w1_ref   : (KH, KW, c_up+c_sk, Cm)  bf16   b1: (1, Cm) f32
    w2_ref   : (KH, KW, Cm, Co)         bf16   b2: (1, Co) f32
    o_ref    : (1, H, W, Co)
    cat_pad  : (H+2, W+2, c_up+c_sk) f32 VMEM scratch (conv1 input, zero halo)
    h_pad    : (H+2, W+2, Cm)        f32 VMEM scratch (conv2 input, zero halo)
    """
    f32 = jnp.float32
    bf16 = jnp.bfloat16
    c_cat = cat_pad.shape[-1]
    cmid = w1_ref.shape[-1]
    cout = o_ref.shape[-1]
    dn = (((2,), (0,)), ((), ()))

    # --- halos: zero only the 1-wide border; interiors are fully overwritten
    #     below, so this stays correct when the batch axis is split across TCs.
    cat_pad[0:1, :, :] = jnp.zeros((1, W + 2, c_cat), f32)
    cat_pad[H + 1:H + 2, :, :] = jnp.zeros((1, W + 2, c_cat), f32)
    cat_pad[1:H + 1, 0:1, :] = jnp.zeros((H, 1, c_cat), f32)
    cat_pad[1:H + 1, W + 1:W + 2, :] = jnp.zeros((H, 1, c_cat), f32)
    h_pad[0:1, :, :] = jnp.zeros((1, W + 2, cmid), f32)
    h_pad[H + 1:H + 2, :, :] = jnp.zeros((1, W + 2, cmid), f32)
    h_pad[1:H + 1, 0:1, :] = jnp.zeros((H, 1, cmid), f32)
    h_pad[1:H + 1, W + 1:W + 2, :] = jnp.zeros((H, 1, cmid), f32)

    # --- fill the concatenated interior: channels [0:c_up] = upsampled tensor
    #     (placed per the static F.pad offsets, crop handled by src_*),
    #     channels [c_up:] = skip.  torch.cat / F.pad never touch HBM.
    if not up_covers_interior:
        cat_pad[1:H + 1, 1:W + 1, 0:c_up] = jnp.zeros((H, W, c_up), f32)
    cat_pad[1 + dst_r0:1 + dst_r0 + copy_h,
            1 + dst_c0:1 + dst_c0 + copy_w, 0:c_up] = (
        up_ref[0, src_r0:src_r0 + copy_h, src_c0:src_c0 + copy_w, :].astype(f32))
    cat_pad[1:H + 1, 1:W + 1, c_up:c_cat] = skip_ref[0].astype(f32)

    # --- conv1: 9 taps over the full concatenated channel axis, bf16 operands,
    #     f32 accumulation; bias/ReLU in f32.
    b1b = b1_ref[0].astype(f32)[None, None, :]               # hoisted broadcast
    acc = jnp.zeros((H, W, cmid), f32)
    for kh in range(KH):
        for kw in range(KW):
            acc += jax.lax.dot_general(
                cat_pad[kh:kh + H, kw:kw + W, :].astype(bf16), w1_ref[kh, kw],
                dimension_numbers=dn, preferred_element_type=f32)
    h = jnp.maximum(acc + b1b, 0.0)

    # Intermediate activation stays in VMEM (zero halo) -> no HBM round trip.
    h_pad[1:H + 1, 1:W + 1, :] = h

    # --- conv2.
    b2b = b2_ref[0].astype(f32)[None, None, :]
    acc2 = jnp.zeros((H, W, cout), f32)
    for kh in range(KH):
        for kw in range(KW):
            acc2 += jax.lax.dot_general(
                h_pad[kh:kh + H, kw:kw + W, :].astype(bf16), w2_ref[kh, kw],
                dimension_numbers=dn, preferred_element_type=f32)
    o_ref[0] = (acc2 + b2b).astype(o_ref.dtype)


def fused_convblock_pallas(up_nhwc, skip_nhwc, w1_bf16, b1, w2_bf16, b2):
    """pad/crop(up) -> cat([up, skip], -1) -> conv3x3 -> ReLU -> conv3x3."""
    N, Hu, Wu, c_up = up_nhwc.shape
    _, Hs, Ws, c_sk = skip_nhwc.shape
    KH, KW, c_cat, cmid = w1_bf16.shape
    cout = w2_bf16.shape[-1]
    assert c_cat == c_up + c_sk and KH == 3 and KW == 3

    # Static placement of `up` inside the skip-sized canvas, matching
    # F.pad([dw//2, dw-dw//2, dh//2, dh-dh//2]) including negative pads (crop).
    dh, dw = Hs - Hu, Ws - Wu
    top, left = dh // 2, dw // 2
    dst_r0, dst_c0 = max(top, 0), max(left, 0)
    src_r0, src_c0 = max(-top, 0), max(-left, 0)
    copy_h = min(Hu - src_r0, Hs - dst_r0)
    copy_w = min(Wu - src_c0, Ws - dst_c0)
    assert copy_h > 0 and copy_w > 0
    up_covers_interior = (dst_r0 == 0 and dst_c0 == 0
                          and copy_h == Hs and copy_w == Ws)

    kernel = partial(
        _fused_convblock_kernel, H=Hs, W=Ws, c_up=c_up, KH=KH, KW=KW,
        dst_r0=dst_r0, dst_c0=dst_c0, src_r0=src_r0, src_c0=src_c0,
        copy_h=copy_h, copy_w=copy_w, up_covers_interior=up_covers_interior)

    return pl.pallas_call(
        kernel,
        out_shape=jax.ShapeDtypeStruct((N, Hs, Ws, cout), skip_nhwc.dtype),
        grid=(N,),
        in_specs=[
            pl.BlockSpec((1, Hu, Wu, c_up), lambda n: (n, 0, 0, 0)),
            pl.BlockSpec((1, Hs, Ws, c_sk), lambda n: (n, 0, 0, 0)),
            pl.BlockSpec((KH, KW, c_cat, cmid), lambda n: (0, 0, 0, 0)),
            pl.BlockSpec((1, cmid), lambda n: (0, 0)),
            pl.BlockSpec((KH, KW, cmid, cout), lambda n: (0, 0, 0, 0)),
            pl.BlockSpec((1, cout), lambda n: (0, 0)),
        ],
        out_specs=pl.BlockSpec((1, Hs, Ws, cout), lambda n: (n, 0, 0, 0)),
        scratch_shapes=[
            pltpu.VMEM((Hs + 2, Ws + 2, c_cat), jnp.float32),
            pltpu.VMEM((Hs + 2, Ws + 2, cmid), jnp.float32),
        ],
        compiler_params=pltpu.CompilerParams(dimension_semantics=("parallel",)),
    )(up_nhwc, skip_nhwc, w1_bf16, b1.reshape(1, cmid),
      w2_bf16, b2.reshape(1, cout))


# ---------------------------------------------------------------------------
# Module wrapper (PyTorch-facing NCHW interface).
# ---------------------------------------------------------------------------
class UpSampleBlockPallas:
    """UpSampleBlock: ConvTranspose2d(k=2,s=2) -> pad -> concat -> ConvBlock."""

    def __init__(self, in_channels, out_channels, *, key):
        f = 3
        cat_ch = 2 * out_channels
        k = jax.random.split(key, 6)

        def u(kk, shape, bound):
            return jax.random.uniform(kk, shape, jnp.float32, -bound, bound)

        # ConvTranspose2d weight kept (kH, kW, Cin, Cout); NOTE: real PyTorch
        # ConvTranspose2d stores (Cin, Cout, kH, kW) -> transpose(2, 3, 0, 1)
        # when importing checkpoints.
        bu = 1.0 / float(jnp.sqrt(in_channels * 2 * 2))
        self.w_up = u(k[0], (2, 2, in_channels, out_channels), bu)
        self.b_up = u(k[1], (out_channels,), bu)
        b1 = 1.0 / float(jnp.sqrt(cat_ch * f * f))
        self.w1 = u(k[2], (f, f, cat_ch, out_channels), b1)        # HWIO
        self.b1 = u(k[3], (out_channels,), b1)
        b2 = 1.0 / float(jnp.sqrt(out_channels * f * f))
        self.w2 = u(k[4], (f, f, out_channels, out_channels), b2)  # HWIO
        self.b2 = u(k[5], (out_channels,), b2)

        # Fold the 2x2 transposed-conv taps into the output-channel axis:
        #   w_up_mat[a, ci, b*Cout + c] = w_up[a, b, ci, c]     (bf16 operand)
        self.w_up_mat = jnp.transpose(self.w_up, (0, 2, 1, 3)).reshape(
            2, in_channels, 2 * out_channels).astype(jnp.bfloat16)
        self.b_up_mat = jnp.tile(self.b_up, 2).reshape(1, 2 * out_channels)
        # bf16 conv weights (MXU operands); biases stay f32.
        self.w1_bf16 = self.w1.astype(jnp.bfloat16)
        self.w2_bf16 = self.w2.astype(jnp.bfloat16)

    def __call__(self, x_nchw, skip_nchw):
        # NCHW -> NHWC once at entry (in a full UNet these transposes are
        # hoisted to model entry / exit, not paid per block).
        x = jnp.transpose(x_nchw, (0, 2, 3, 1))
        skip = jnp.transpose(skip_nchw, (0, 2, 3, 1))

        up = upconv2x2_pallas(x, self.w_up_mat, self.b_up_mat)   # bf16 NHWC

        # pad/crop-to-skip-size, channel concat, conv3x3+ReLU+conv3x3 are all
        # fused in one pallas_call; padding never materializes in HBM.
        y = fused_convblock_pallas(up, skip, self.w1_bf16, self.b1,
                                   self.w2_bf16, self.b2)
        return jnp.transpose(y, (0, 3, 1, 2))                    # NHWC -> NCHW


# ---------------------------------------------------------------------------
# Pure-JAX reference (mirrors the PyTorch forward, f32).
# ---------------------------------------------------------------------------
def _ref_upsample_block(x_nchw, skip_nchw, blk):
    x = jnp.transpose(x_nchw, (0, 2, 3, 1))
    skip = jnp.transpose(skip_nchw, (0, 2, 3, 1))

    # ConvTranspose2d(k=2, s=2): up[n, 2i+a, 2j+b, c] = sum_ci x[n,i,j,ci] w[a,b,ci,c]
    t = jnp.einsum('nijc,abcd->niajbd', x, blk.w_up)
    N, Hin, _, Win, _, Cout = t.shape
    up = t.reshape(N, 2 * Hin, 2 * Win, Cout) + blk.b_up[None, None, None, :]

    dh = skip.shape[1] - up.shape[1]
    dw = skip.shape[2] - up.shape[2]
    if dh != 0 or dw != 0:
        up = jnp.pad(up, ((0, 0), (dh // 2, dh - dh // 2),
                          (dw // 2, dw - dw // 2), (0, 0)))
    cat = jnp.concatenate([up, skip], axis=-1)

    def conv3x3(v, w, b):
        y = jax.lax.conv_general_dilated(
            v, w, window_strides=(1, 1), padding=[(1, 1), (1, 1)],
            dimension_numbers=("NHWC", "HWIO", "NHWC"))
        return y + b[None, None, None, :]

    h = jnp.maximum(conv3x3(cat, blk.w1, blk.b1), 0.0)
    y = conv3x3(h, blk.w2, blk.b2)
    return jnp.transpose(y, (0, 3, 1, 2))


if __name__ == "__main__":
    key = jax.random.PRNGKey(0)
    kx, ks, kp = jax.random.split(key, 3)

    N = 2
    in_channels, out_channels = 16, 8
    Hin = Win = 8                      # decoder input; skip & output are 16x16

    x = jax.random.normal(kx, (N, in_channels, Hin, Win), jnp.float32)          # NCHW
    skip = jax.random.normal(ks, (N, out_channels, 2 * Hin, 2 * Win), jnp.float32)

    block = UpSampleBlockPallas(in_channels, out_channels, key=kp)

    out = jax.block_until_ready(block(x, skip))

    ref = _ref_upsample_block(x, skip, block)
    assert out.shape == (N, out_channels, 2 * Hin, 2 * Win), out.shape
    max_err = float(jnp.max(jnp.abs(out - ref)))
    # bf16 MXU operands with f32 accumulation -> loosened tolerance vs f32 ref.
    assert jnp.allclose(out, ref, atol=5e-2, rtol=5e-2), max_err

    print("KERNEL_OK")
</pallas_src>

<mosaic_0001>
module attributes {stable_mosaic.version = 11 : i64} {
  func.func @_upconv2x2_kernel(%arg0: i32, %arg1: memref<1x8x8x16xf32, #tpu.memory_space<vmem>>, %arg2: memref<2x16x16xbf16, #tpu.memory_space<vmem>>, %arg3: memref<1x16xf32, #tpu.memory_space<vmem>>, %arg4: memref<1x8x2x8x16xbf16, #tpu.memory_space<vmem>>) attributes {dimension_semantics = [#tpu.dimension_semantics<parallel>], iteration_bounds = array<i64: 2>, scalar_prefetch = 0 : i64, scratch_operands = 0 : i64, tpu.core_type = #tpu.core_type<tc>, window_params = [{transform_indices = @transform_0, window_bounds = array<i64: 1, 8, 8, 16>}, {pipeline_mode = #tpu.pipeline_mode<synchronous>, transform_indices = @transform_1, window_bounds = array<i64: 2, 16, 16>}, {pipeline_mode = #tpu.pipeline_mode<synchronous>, transform_indices = @transform_2, window_bounds = array<i64: 1, 16>}, {transform_indices = @transform_3, window_bounds = array<i64: 1, 8, 2, 8, 16>}]} {
    %c0 = arith.constant 0 : index
    %c0_0 = arith.constant 0 : index
    %c0_1 = arith.constant 0 : index
    %c0_2 = arith.constant 0 : index
    %0 = vector.load %arg1[%c0, %c0_0, %c0_1, %c0_2] : memref<1x8x8x16xf32, #tpu.memory_space<vmem>>, vector<1x8x8x16xf32>
    %1 = vector.shape_cast %0 : vector<1x8x8x16xf32> to vector<8x8x16xf32>
    %2 = arith.truncf %1 : vector<8x8x16xf32> to vector<8x8x16xbf16>
    %c0_3 = arith.constant 0 : index
    %c0_4 = arith.constant 0 : index
    %3 = vector.load %arg3[%c0_3, %c0_4] : memref<1x16xf32, #tpu.memory_space<vmem>>, vector<1x16xf32>
    %4 = vector.shape_cast %3 : vector<1x16xf32> to vector<16xf32>
    %5 = vector.shape_cast %4 : vector<16xf32> to vector<1x1x16xf32>
    %c0_5 = arith.constant 0 : index
    %c0_6 = arith.constant 0 : index
    %c0_7 = arith.constant 0 : index
    %6 = vector.load %arg2[%c0_5, %c0_6, %c0_7] : memref<2x16x16xbf16, #tpu.memory_space<vmem>>, vector<1x16x16xbf16>
    %7 = vector.shape_cast %6 : vector<1x16x16xbf16> to vector<16x16xbf16>
    %cst = arith.constant dense<0.000000e+00> : vector<8x8x16xf32>
    %8 = tpu.matmul %2, %7, %cst {dimension_numbers = #tpu.dot_dimension_numbers<[2], [0], [0, 1], [1], [0, 0, 0, 1, 1, 1], [], []>} : vector<8x8x16xbf16>, vector<16x16xbf16>, vector<8x8x16xf32> -> vector<8x8x16xf32>
    %9 = vector.broadcast %5 : vector<1x1x16xf32> to vector<8x8x16xf32>
    %10 = arith.addf %8, %9 : vector<8x8x16xf32>
    %11 = arith.truncf %10 : vector<8x8x16xf32> to vector<8x8x16xbf16>
    %c0_8 = arith.constant 0 : index
    %c0_9 = arith.constant 0 : index
    %c0_10 = arith.constant 0 : index
    %c0_11 = arith.constant 0 : index
    %c0_12 = arith.constant 0 : index
    %12 = vector.load %arg4[%c0_8, %c0_9, %c0_10, %c0_11, %c0_12] : memref<1x8x2x8x16xbf16, #tpu.memory_space<vmem>>, vector<1x8x1x8x16xbf16>
    %13 = vector.shape_cast %12 : vector<1x8x1x8x16xbf16> to vector<8x8x16xbf16>
    %14 = vector.shape_cast %11 : vector<8x8x16xbf16> to vector<1x8x1x8x16xbf16>
    tpu.vector_store %arg4[%c0_8, %c0_9, %c0_10, %c0_11, %c0_12], %14 {strides = array<i32>} : memref<1x8x2x8x16xbf16, #tpu.memory_space<vmem>>, vector<1x8x1x8x16xbf16>,
    %c1 = arith.constant 1 : index
    %c0_13 = arith.constant 0 : index
    %c0_14 = arith.constant 0 : index
    %15 = vector.load %arg2[%c1, %c0_13, %c0_14] : memref<2x16x16xbf16, #tpu.memory_space<vmem>>, vector<1x16x16xbf16>
    %16 = vector.shape_cast %15 : vector<1x16x16xbf16> to vector<16x16xbf16>
    %cst_15 = arith.constant dense<0.000000e+00> : vector<8x8x16xf32>
    %17 = tpu.matmul %2, %16, %cst_15 {dimension_numbers = #tpu.dot_dimension_numbers<[2], [0], [0, 1], [1], [0, 0, 0, 1, 1, 1], [], []>} : vector<8x8x16xbf16>, vector<16x16xbf16>, vector<8x8x16xf32> -> vector<8x8x16xf32>
    %18 = vector.broadcast %5 : vector<1x1x16xf32> to vector<8x8x16xf32>
    %19 = arith.addf %17, %18 : vector<8x8x16xf32>
    %20 = arith.truncf %19 : vector<8x8x16xf32> to vector<8x8x16xbf16>
    %c0_16 = arith.constant 0 : index
    %c0_17 = arith.constant 0 : index
    %c1_18 = arith.constant 1 : index
    %c0_19 = arith.constant 0 : index
    %c0_20 = arith.constant 0 : index
    %21 = vector.load %arg4[%c0_16, %c0_17, %c1_18, %c0_19, %c0_20] : memref<1x8x2x8x16xbf16, #tpu.memory_space<vmem>>, vector<1x8x1x8x16xbf16>
    %22 = vector.shape_cast %21 : vector<1x8x1x8x16xbf16> to vector<8x8x16xbf16>
    %23 = vector.shape_cast %20 : vector<8x8x16xbf16> to vector<1x8x1x8x16xbf16>
    tpu.vector_store %arg4[%c0_16, %c0_17, %c1_18, %c0_19, %c0_20], %23 {strides = array<i32>} : memref<1x8x2x8x16xbf16, #tpu.memory_space<vmem>>, vector<1x8x1x8x16xbf16>,
    return
  }
  func.func @transform_0(%arg0: i32) -> (i32, i32, i32, i32) {
    %c0_i32 = arith.constant 0 : i32
    %c0_i32_0 = arith.constant 0 : i32
    %c0_i32_1 = arith.constant 0 : i32
    %c0_i32_2 = arith.constant 0 : i32
    return %arg0, %c0_i32, %c0_i32_0, %c0_i32_1 : i32, i32, i32, i32
  }
  func.func @transform_1(%arg0: i32) -> (i32, i32, i32) {
    %c0_i32 = arith.constant 0 : i32
    %c0_i32_0 = arith.constant 0 : i32
    %c0_i32_1 = arith.constant 0 : i32
    %c0_i32_2 = arith.constant 0 : i32
    return %c0_i32, %c0_i32_0, %c0_i32_1 : i32, i32, i32
  }
  func.func @transform_2(%arg0: i32) -> (i32, i32) {
    %c0_i32 = arith.constant 0 : i32
    %c0_i32_0 = arith.constant 0 : i32
    %c0_i32_1 = arith.constant 0 : i32
    return %c0_i32, %c0_i32_0 : i32, i32
  }
  func.func @transform_3(%arg0: i32) -> (i32, i32, i32, i32, i32) {
    %c0_i32 = arith.constant 0 : i32
    %c0_i32_0 = arith.constant 0 : i32
    %c0_i32_1 = arith.constant 0 : i32
    %c0_i32_2 = arith.constant 0 : i32
    %c0_i32_3 = arith.constant 0 : i32
    return %arg0, %c0_i32, %c0_i32_0, %c0_i32_1, %c0_i32_2 : i32, i32, i32, i32, i32
  }
}

</mosaic_0001>

<bundles_post_ra>
// kernel: tpu_custom_call.1
= control target key start
LH: loop header
LB: loop body
LE: loop exit
PB: predicated region body
PF: predicated region fallthrough
CT: control target
= control target key end

     0   :  { %8 = vsyncpa [#allocation3], 0  ;;  %s1089_s0 = inlined_call_operand.hbm [shape: f32[2,8,8,16], index: 0, kind: input, shape index: {}]   ;;  %s1090_s1 = inlined_call_operand.hbm [shape: bf16[2,16,16], index: 1, kind: input, shape index: {}]   ;;  %s1091_s2 = inlined_call_operand.vmem [shape: f32[1,16], index: 2, kind: input, shape index: {}]   ;;  %s1092_s3 = inlined_call_operand.hbm [shape: bf16[2,8,2,8,16], index: 3, kind: output, shape index: {}]  }
   0x1   :  { %10 = vsyncpa [#allocation3 + $0x1], 0 }
   0x2   :  { %11 = vsyncpa [#allocation6], 0 }
   0x3   :  { %12 = vsyncpa [#allocation4], 0 }
   0x4   :  { %14 = vsyncpa [#allocation4 + $0x1], 0  ;;  %s838_s12 = smov 0   ;;  %s840_s13 = smov 0  }
   0x5   :  { %s842_s14 = smov 0   ;;  %s844_s15 = smov 0  }
   0x6 LB: > { %s859_s16 = sadd.s32 4294967295, %s807_s15   ;;  %s539_s17 = sadd.s32 4294967294, %s807_s15   ;;  %s807_s15 = sphi %s844_s15, %s1112_s15   ;;  %s803_s14 = sphi %s842_s14, %s1111_s14   ;;  %s799_s13 = sphi %s840_s13, %s1110_s13   ;;  %s795_s12 = sphi %s838_s12, %s1109_s12  }
   0x7   : > { %p40_p0 = scmp.ne.s32.totalorder %s799_s13, %s795_s12  ;;  %p1093_p1 = scmp.eq.s32.totalorder %s859_s16, 0 }
   0x8   : > { %p112_p3 = scmp.eq.s32.totalorder %s539_s17, 1  ;;  %p540_p5 = scmp.ge.s32.totalorder %s807_s15, 1 }
   0x9   : > { %p868_p4 = por %p1093_p1, %p40_p0  ;;  %p119_p7 = scmp.lt.s32.totalorder %s807_s15, 3 }
   0xa   : > { %p873_p6 = por %p112_p3, %p40_p0  ;;  %s809_s21 = smov [#allocation5]  }
   0xb   : > { %s1096_s18 = scalar_select %p868_p4, 1, 0 }
   0xc   : > { %s1097_s19 = scalar_select %p873_p6, 1, 0 }
   0xd   : > { %p878_p8 = pnand %p540_p5, %p119_p7  ;;  %s131_s22 = sshll.u32 %s809_s21, 4  ;;  %s882_s22 = int_to_ptr.vmem [resolvable:$true] %s131_s22 }
   0xe   : > { %s894_s24 = sadd.s32 1, %s807_s15   ;;  %s27_s25 = sadd.s32 1, %s803_s14 }
   0xf   : > { %s1098_s20 = scalar_select %p878_p8, 1, 0 }
  0x10   : > { %p622_p9 = pneg %p878_p8  ;;  %s24_s26 = ssub.s32 %s807_s15, %s894_s24 }
  0x11   : > { %s679_s29 = scalar_lea.hbm %s1090_s1, 256 }
  0x12   : > { %p889_p11 = pnand %p622_p9, %p1093_p1  ;;  %p680_p12 = scmp.ne.s32.totalorder %s1090_s1, %s679_s29 }
  0x13   : > { %p686_p5 = scmp.lt.u32.totalorder %s679_s29, %s1090_s1 }
  0x14   : > { %p681_p13 = pneg %p889_p11 }
  0x16   : > { %p682_p0 = pnand %p681_p13, %p680_p12 }
  0x18   : > { %p683_p3 = pneg %p682_p0 }
  0x1a   : > { %p688_p7 = pnand %p686_p5, %p683_p3 }
  0x1c   : > { %691 = shalt.err (!%p688_p7)
}
  0x1d   : > { %s692_s7 = scalar_lea.vmem %s882_s22, 256  ;;  %p700_p2 = scmp.lt.s32.totalorder %s882_s22, %s882_s22 }
  0x1e   : > { %p693_p9 = scmp.ne.s32.totalorder %s882_s22, %s692_s7  ;;  %p701_p6 = scmp.lt.s32.totalorder %s692_s7, %s692_s7 }
  0x20   : > { %p695_p10 = pnand %p693_p9, %p681_p13  ;;  %p702_p4 = por %p701_p6, %p700_p2 }
  0x22   : > { %p696_p1 = pneg %p695_p10 }
  0x24   : > { %p703_p8 = pnand %p702_p4, %p696_p1 }
  0x26   : > { %706 = shalt.err (!%p703_p8)
}
  0x27   : > { %s810_s8 = smov 64   ;;  %s811_s9 = smov 4  }
  0x28   : > { %625 = dma.hbm_to_vmem [thread:$0]  (!%p889_p11), %s1090_s1, 256, %s882_s22, [#allocation6], %s810_s8, %s810_s8, %s811_s9  }
  0x29   : > { %p25_p2 = scmp.eq.s32.totalorder %s24_s26, 0  ;;  %p34_p1 = scmp.ne.s32.totalorder %s803_s14, %s799_s13 }
  0x2a   : > { %p35_p4 = scmp.eq.s32.totalorder %s807_s15, 0  ;;  %p635_p6 = scmp.lt.s32.totalorder %s807_s15, 2 }
  0x2b   : > { %s925_s17 = scalar_select %p25_p2, %s803_s14, %s27_s25  }
  0x2c   : > { %p36_p8 = por %p35_p4, %p34_p1  ;;  %p1100_p10 = scmp.eq.s32.totalorder %s859_s16, 1 }
  0x2d   : > { %s148_s27 = sand.u32 1, %s803_s14   ;;  %s578_s28 = sshll.u32 %s807_s15, 10 }
  0x2e   : > { %p929_p12 = por %p1100_p10, %p34_p1  ;;  %s543_s29 = sshll.u32 %s148_s27, 6 }
  0x2f   : > { %s938_s4 = scalar_lea.hbm %s1089_s0, %s578_s28  ;;  %s152_s22 = scalar_lea.vmem [#allocation2], %s543_s29 }
  0x30   : > { %s159_s25 = sshll.u32 %s152_s22, 4  ;;  %p940_p11 = pnand %p635_p6, %p36_p8  ;;  %s944_s25 = int_to_ptr.vmem [resolvable:$true] %s159_s25 }
  0x31   : > { %s946_s5 = scalar_lea.sflag [#allocation3], %s148_s27  ;;  %s707_s6 = scalar_lea.hbm %s938_s4, 1024 }
  0x32   : > { %p708_p13 = scmp.ne.s32.totalorder %s938_s4, %s707_s6  ;;  %p709_p0 = pneg %p940_p11 }
  0x33   : > { %s712_s9 = scalar_lea.hbm %s1089_s0, 2048  ;;  %p713_p7 = scmp.lt.u32.totalorder %s938_s4, %s1089_s0 }
  0x34   : > { %p710_p3 = pnand %p709_p0, %p708_p13  ;;  %p714_p9 = scmp.lt.u32.totalorder %s712_s9, %s707_s6 }
  0x35   : > { %p716_p1 = scmp.lt.u32.totalorder %s707_s6, %s938_s4 }
  0x36   : > { %p711_p5 = pneg %p710_p3  ;;  %p715_p2 = por %p714_p9, %p713_p7 }
  0x38   : > { %p717_p4 = por %p716_p1, %p715_p2 }
  0x3a   : > { %p718_p6 = pnand %p717_p4, %p711_p5 }
  0x3c   : > { %721 = shalt.err (!%p718_p6)
}
  0x3d   : > { %s722_s27 = scalar_lea.vmem %s944_s25, 1024  ;;  %s812_s28 = smov [#allocation2]  }
  0x3e   : > { %p723_p8 = scmp.ne.s32.totalorder %s944_s25, %s722_s27  ;;  %s727_s29 = sshll.u32 %s812_s28, 4  ;;  %s728_s29 = int_to_ptr.vmem [resolvable:$false] %s727_s29 }
  0x3f   : > { %s729_s23 = scalar_lea.vmem %s728_s29, 2048  ;;  %p730_p3 = scmp.lt.s32.totalorder %s944_s25, %s728_s29 }
  0x40   : > { %p725_p10 = pnand %p723_p8, %p709_p0  ;;  %p731_p7 = scmp.lt.s32.totalorder %s729_s23, %s722_s27 }
  0x42   : > { %p726_p13 = pneg %p725_p10  ;;  %p732_p9 = por %p731_p7, %p730_p3 }
  0x44   : > { %p733_p2 = pnand %p732_p9, %p726_p13 }
  0x46   : > { %736 = shalt.err (!%p733_p2)
}
  0x47   : > { %s813_s30 = smov 128   ;;  %s814_s22 = smov 8  }
  0x48   : > { %629 = dma.hbm_to_vmem [thread:$0]  (!%p940_p11), %s938_s4, 1024, %s944_s25, %s946_s5, %s813_s30, %s813_s30, %s814_s22  }
  0x49   : > { %p1103_p0 = scmp.ne.s32.totalorder %s1098_s20, 0 }
  0x4a   : > { %s977_s6 = sand.u32 (!%p1103_p0), 1, %s799_s13   ;;  %p1104_p5 = scmp.ne.s32.totalorder (!%p1103_p0), %s1096_s18, 0 }
  0x4b   : > { %171 = sbr.rel (%p1103_p0) target bundleno = 333 (0x14d), region = 32  ;;  %s547_s7 = sshll.u32 (!%p1103_p0), %s977_s6, 6 }
  0x4c   : > { %s174_s8 = scalar_lea.sflag (!%p1103_p0), [#allocation3], %s977_s6  ;;  %s177_s9 = scalar_lea.vmem (!%p1103_p0), [#allocation2], %s547_s7 }
  0x52   : > { %782 = dma.done.wait (%p1104_p5), %s174_s8, 1024  }
  0x53   : > { %784 = vsyncadd (%p1104_p5), %s174_s8, 4294966272  ;;  %p1105_p11 = scmp.eq.s32.totalorder %s859_s16, 0 }
  0x55   : > { %786 = dma.done.wait (%p1105_p11), [#allocation6], 256   ;;  %p1106_p1 = pmov %p1105_p11 }
  0x56   : > { %v677_v0 = vld [vmem:[#allocation5] sm:$0xff]   ;;  %v678_v1 = vld [vmem:[#allocation5 + $0x8] sm:$0xff]   ;;  %vm256_vm0 = vcmask 130048   ;;  %v207_v4 = vld [vmem:[%s177_s9 + $0x10] sm:$0xff]  ;;  %vm342_vm1 = vcmask 125952   ;;  %s1004_s4 = scalar_lea.vmem [#allocation7], %s547_s7 }
  0x57   : > { %788 = vsyncadd (%p1106_p1), [#allocation6], 4294967040  ;;  %594 = vmatprep.subr.bf16.mxu0 %v677_v0  ;;  %v205_v2 = vld [vmem:[%s177_s9] sm:$0xff]  ;;  %v206_v3 = vld [vmem:[%s177_s9 + $0x8] sm:$0xff]  ;;  %604 = vmatprep.subr.bf16.mxu1 %v678_v1  ;;  %s583_s25 = sshll.u32 %s859_s16, 10  ;;  %s456_s26 = sshll.u32 %s1004_s4, 4  ;;  %s1035_s26 = int_to_ptr.vmem [resolvable:$true] %s456_s26 }
  0x58   : > { %595 = vmatpush3.bf16.msra.mxu0 %v677_v0  ;;  %v579_v5 = vpack.c.bf16 %v206_v3, %v205_v2  ;;  %v208_v6 = vld [vmem:[%s177_s9 + $0x18] sm:$0xff]  ;;  %v209_v7 = vld [vmem:[%s177_s9 + $0x20] sm:$0xff]  ;;  %v210_v8 = vld [vmem:[%s177_s9 + $0x28] sm:$0xff]  ;;  %605 = vmatpush3.bf16.msra.mxu1 %v678_v1  ;;  %s1033_s10 = scalar_lea.hbm %s1092_s3, %s583_s25  ;;  %s443_s11 = scalar_lea.sflag [#allocation4], %s977_s6 }
  0x59   : > { %v580_v9 = vpack.c.bf16 %v208_v6, %v207_v4  ;;  %v581_v10 = vpack.c.bf16 %v210_v8, %v209_v7  ;;  %v211_v11 = vld [vmem:[%s177_s9 + $0x30] sm:$0xff]  ;;  %v212_v12 = vld [vmem:[%s177_s9 + $0x38] sm:$0xff]  ;;  %v550_v14 = vld [vmem:[%s1091_s2] ss:$0 sm:$0xff]  ;;  %s737_s27 = scalar_lea.vmem %s1035_s26, 1024  ;;  %s815_s28 = smov [#allocation7]  }
  0x5a   : > { %596 = vmatprep.mubr.msk.bf16.mxu0 %vm256_vm0, %v579_v5  ;;  %606 = vmatprep.mubr.msk.bf16.mxu1 %vm256_vm0, %v579_v5  ;;  %v582_v13 = vpack.c.bf16 %v212_v12, %v211_v11  ;;  %p738_p4 = scmp.ne.s32.totalorder %s1035_s26, %s737_s27  ;;  %s741_s29 = sshll.u32 %s815_s28, 4  ;;  %s742_s29 = int_to_ptr.vmem [resolvable:$false] %s741_s29 }
  0x5b   : > { %597 = vmatmul.mubr.msk.bf16.vlgmr.msra.gmra.mrb[0].mxu0 %vm256_vm0, %v580_v9  ;;  %607 = vmatmul.mubr.msk.bf16.vlgmr.msra.gmra.mrb[0].mxu1 %vm256_vm0, %v580_v9  ;;  %s743_s23 = scalar_lea.vmem %s742_s29, 2048  ;;  %p744_p10 = scmp.lt.s32.totalorder %s1035_s26, %s742_s29 }
  0x5c   : > { %600 = vmatprep.mubr.msk.bf16.mxu0 %vm256_vm0, %v581_v10  ;;  %610 = vmatprep.mubr.msk.bf16.mxu1 %vm256_vm0, %v581_v10  ;;  %p739_p6 = pnand %p738_p4, %p929_p12  ;;  %p745_p13 = scmp.lt.s32.totalorder %s743_s23, %s737_s27 }
  0x5e   : > { %p740_p8 = pneg %p739_p6  ;;  %p746_p3 = por %p745_p13, %p744_p10 }
  0x60   : > { %p747_p7 = pnand %p746_p3, %p740_p8 }
  0x63   : > { %601 = vmatmul.mubr.msk.bf16.gmra.mrb[4].mxu0 %vm256_vm0, %v582_v13  ;;  %611 = vmatmul.mubr.msk.bf16.gmra.mrb[4].mxu1 %vm256_vm0, %v582_v13 }
 0x12e   : > { %v598_v15 = vpop.f32.mrb[0].mxu0  ;;  %v608_v17 = vpop.f32.mrb[0].mxu1 }
 0x12f   : > { %v312_v16 = vadd.f32 %v598_v15, %v550_v14  ;;  %v303_v18 = vpop.f32.mrb[1].mxu0  ;;  %v403_v19 = vadd.f32 %v608_v17, %v550_v14  ;;  %v394_v21 = vpop.f32.mrb[1].mxu1 }
 0x130   : > { %v304_v20 = vadd.f32 %v550_v14, %v303_v18  ;;  %v599_v22 = vpop.f32.mrb[2].mxu0  ;;  %v395_v24 = vadd.f32 %v550_v14, %v394_v21  ;;  %v609_v26 = vpop.f32.mrb[2].mxu1 }
 0x131   : > { %v336_v23 = vpack.c.bf16 %v312_v16, %v312_v16  ;;  %v315_v25 = vadd.f32 %v599_v22, %v550_v14  ;;  %v306_v27 = vpop.f32.mrb[3].mxu0  ;;  %v427_v28 = vpack.c.bf16 %v403_v19, %v403_v19  ;;  %v406_v30 = vadd.f32 %v609_v26, %v550_v14  ;;  %v397_v32 = vpop.f32.mrb[3].mxu1 }
 0x132   : > { %v334_v29 = vpack.c.bf16 %v304_v20, %v304_v20  ;;  %v307_v31 = vadd.f32 %v550_v14, %v306_v27  ;;  %v425_v33 = vpack.c.bf16 %v395_v24, %v395_v24  ;;  %v398_v35 = vadd.f32 %v550_v14, %v397_v32 }
 0x133   : > { %345 = vst.msk [vmem:[%s1004_s4 + $0x10] sm:$0xf] %vm342_vm1, %v336_v23  ;;  %v337_v34 = vpack.c.bf16 %v315_v25, %v315_v25  ;;  %567 = vst.msk [vmem:[%s1004_s4 + $0x14] sm:$0xf] %vm342_vm1, %v427_v28  ;;  %v428_v36 = vpack.c.bf16 %v406_v30, %v406_v30 }
 0x134   : > { %343 = vst.msk [vmem:[%s1004_s4] sm:$0xf] %vm342_vm1, %v334_v29  ;;  %v335_v37 = vpack.c.bf16 %v307_v31, %v307_v31  ;;  %565 = vst.msk [vmem:[%s1004_s4 + $0x4] sm:$0xf] %vm342_vm1, %v425_v33  ;;  %v426_v38 = vpack.c.bf16 %v398_v35, %v398_v35 }
 0x135   : > { %346 = vst.msk [vmem:[%s1004_s4 + $0x18] sm:$0xf] %vm342_vm1, %v337_v34  ;;  %568 = vst.msk [vmem:[%s1004_s4 + $0x1c] sm:$0xf] %vm342_vm1, %v428_v36 }
 0x136   : > { %344 = vst.msk [vmem:[%s1004_s4 + $0x8] sm:$0xf] %vm342_vm1, %v335_v37  ;;  %v602_v39 = vpop.f32.mrb[4].mxu0  ;;  %566 = vst.msk [vmem:[%s1004_s4 + $0xc] sm:$0xf] %vm342_vm1, %v426_v38  ;;  %v612_v41 = vpop.f32.mrb[4].mxu1 }
 0x137   : > { %v328_v40 = vadd.f32 %v602_v39, %v550_v14  ;;  %v319_v42 = vpop.f32.mrb[5].mxu0  ;;  %v419_v43 = vadd.f32 %v612_v41, %v550_v14  ;;  %v410_v45 = vpop.f32.mrb[5].mxu1 }
 0x138   : > { %v320_v44 = vadd.f32 %v550_v14, %v319_v42  ;;  %v603_v46 = vpop.f32.mrb[6].mxu0  ;;  %v411_v48 = vadd.f32 %v550_v14, %v410_v45  ;;  %v613_v50 = vpop.f32.mrb[6].mxu1 }
 0x139   : > { %v340_v47 = vpack.c.bf16 %v328_v40, %v328_v40  ;;  %v331_v49 = vadd.f32 %v603_v46, %v550_v14  ;;  %v322_v51 = vpop.f32.mrb[7].mxu0  ;;  %v431_v52 = vpack.c.bf16 %v419_v43, %v419_v43  ;;  %v422_v54 = vadd.f32 %v613_v50, %v550_v14  ;;  %v413_v56 = vpop.f32.mrb[7].mxu1 }
 0x13a   : > { %v338_v53 = vpack.c.bf16 %v320_v44, %v320_v44  ;;  %v323_v55 = vadd.f32 %v550_v14, %v322_v51  ;;  %v429_v57 = vpack.c.bf16 %v411_v48, %v411_v48  ;;  %v414_v59 = vadd.f32 %v550_v14, %v413_v56 }
 0x13b   : > { %349 = vst.msk [vmem:[%s1004_s4 + $0x30] sm:$0xf] %vm342_vm1, %v340_v47  ;;  %v341_v58 = vpack.c.bf16 %v331_v49, %v331_v49  ;;  %571 = vst.msk [vmem:[%s1004_s4 + $0x34] sm:$0xf] %vm342_vm1, %v431_v52  ;;  %v432_v60 = vpack.c.bf16 %v422_v54, %v422_v54 }
 0x13c   : > { %347 = vst.msk [vmem:[%s1004_s4 + $0x20] sm:$0xf] %vm342_vm1, %v338_v53  ;;  %v339_v61 = vpack.c.bf16 %v323_v55, %v323_v55  ;;  %569 = vst.msk [vmem:[%s1004_s4 + $0x24] sm:$0xf] %vm342_vm1, %v429_v57  ;;  %v430_v62 = vpack.c.bf16 %v414_v59, %v414_v59 }
 0x13d   : > { %350 = vst.msk [vmem:[%s1004_s4 + $0x38] sm:$0xf] %vm342_vm1, %v341_v58  ;;  %572 = vst.msk [vmem:[%s1004_s4 + $0x3c] sm:$0xf] %vm342_vm1, %v432_v60 }
 0x13e   : > { %348 = vst.msk [vmem:[%s1004_s4 + $0x28] sm:$0xf] %vm342_vm1, %v339_v61  ;;  %570 = vst.msk [vmem:[%s1004_s4 + $0x2c] sm:$0xf] %vm342_vm1, %v430_v62 }
 0x13f   : > { %750 = shalt.err (!%p747_p7)
}
 0x140   : > { %s751_s30 = scalar_lea.hbm %s1033_s10, 1024  ;;  %s755_s8 = scalar_lea.hbm %s1092_s3, 2048 }
 0x141   : > { %p752_p9 = scmp.ne.s32.totalorder %s1033_s10, %s751_s30  ;;  %p756_p5 = scmp.lt.u32.totalorder %s1033_s10, %s1092_s3 }
 0x142   : > { %p757_p11 = scmp.lt.u32.totalorder %s755_s8, %s751_s30  ;;  %p759_p4 = scmp.lt.u32.totalorder %s751_s30, %s1033_s10 }
 0x143   : > { %p753_p2 = pnand %p752_p9, %p929_p12 }
 0x144   : > { %p758_p1 = por %p757_p11, %p756_p5 }
 0x145   : > { %p754_p0 = pneg %p753_p2 }
 0x146   : > { %p760_p6 = por %p759_p4, %p758_p1 }
 0x148   : > { %p761_p8 = pnand %p760_p6, %p754_p0 }
 0x14a   : > { %764 = shalt.err (!%p761_p8)
}
 0x14b   : > { %s816_s20 = smov 64   ;;  %s817_s4 = smov 4  }
 0x14c   : > { %620 = dma.vmem_to_hbm [thread:$0]  (%p929_p12), %s1035_s26, 1024, %s1033_s10, %s443_s11, %s816_s20, %s816_s20, %s817_s4  }
 0x14d PF: > { %s471_s25 = sand.u32 1, %s795_s12   ;;  %p1107_p10 = scmp.ne.s32.totalorder %s1097_s19, 0 }
 0x14e   : > { %p1108_p13 = scmp.ge.s32.totalorder %s807_s15, 2  ;;  %s472_s16 = scalar_lea.sflag [#allocation4], %s471_s25 }
 0x150   : > { %p631_p3 = pnand %p1108_p13, %p1107_p10 }
 0x152   : > { %790 = dma.done.wait (!%p631_p3), %s472_s16, 1024  }
 0x153   : > { %792 = vsyncadd (!%p631_p3), %s472_s16, 4294966272  ;;  %p17_p7 = scmp.ge.s32.totalorder %s894_s24, 4   ;;  %s1109_s12 = smov %s799_s13 }
 0x154   : > { %s1110_s13 = smov %s803_s14  ;;  %s1111_s14 = smov %s925_s17 }
 0x155   : > { %s1112_s15 = smov %s894_s24  ;;  %19 = sbr.rel (!%p17_p7) target bundleno = 6 (0x6), region = 83 }
 0x15c   :  { %477 = vsyncpa [#allocation3], 1 }
 0x15d   :  { %479 = vsyncpa [#allocation3 + $0x1], 1 }
 0x15e   :  { %480 = vsyncpa [#allocation6], 1 }
 0x15f   :  { %481 = vsyncpa [#allocation4], 1 }
 0x160   :  { %483 = vsyncpa [#allocation4 + $0x1], 1 }

</bundles_post_ra>
